<compile_context>
chip_gen: v7x
topology: tpu7x:2x2x1
jax: 0.10.0
libtpu: 0.0.40
codegen_flags: <defaults>
</compile_context>

<pallas_src>
import math
import functools

import jax
import jax.numpy as jnp
from jax import lax
from jax.experimental import pallas as pl
from jax.experimental.pallas import tpu as pltpu


def _sdpa_kernel(q_ref, k_ref, v_ref, ctx_ref, attn_ref, *, scale, exp_dtype):
    # Block shapes: q (1, TQ, D), k (1, Lk, D), v (1, Lk, Dv_pad).
    q = q_ref[0]                                   # (TQ, D)   native dtype
    k = k_ref[0]                                   # (Lk, D)
    v = v_ref[0]                                   # (Lk, Dv_pad)

    # Fold the scale into q in its *native* dtype (touches TQ*D elements and
    # keeps the bf16 MXU path).  `if scale:` mirrors the torch truthiness
    # check: scale=None / 0.0 means "no scaling".
    if scale:
        q = q * jnp.asarray(scale, dtype=q.dtype)

    # scores = q @ k^T via a contracting-dim choice (Mosaic-native "NT"
    # matmul, same pattern as the reference flash-attention kernel -> no XLU
    # transpose of the (Lk, D) tile); f32 accumulation on the MXU.
    s = lax.dot_general(
        q, k,
        dimension_numbers=(((1,), (1,)), ((), ())),
        preferred_element_type=jnp.float32)        # (TQ, Lk) f32

    # Softmax over the last axis (torch Softmax(dim=2)), max-stabilized.
    # bf16 callers: exp evaluated in bf16 (EUP is the binding unit for small
    # head dims on v6e/v7x); denominator summed in f32; exact reciprocal.
    m = jnp.max(s, axis=-1, keepdims=True)
    e = jnp.exp((s - m).astype(exp_dtype))         # (TQ, Lk)
    denom = jnp.sum(e.astype(jnp.float32), axis=-1, keepdims=True)
    inv = pl.reciprocal(denom, approx=False)       # exact 1/denom, (TQ, 1)

    # Single cast of the (TQ, Lk) tile, reused for the store AND the AV matmul.
    attn = (e * inv.astype(e.dtype)).astype(attn_ref.dtype)

    # TODO(synk): nn.Dropout(attention_dropout) with p=0.0 is the identity; a
    # nonzero p would need pltpu.prng_seed + pltpu.stateful_bernoulli here.

    # context = attention @ v, f32 accumulation on the MXU (bf16 x bf16 for
    # bf16 callers since attn already carries the low-precision output dtype).
    ctx = lax.dot_general(
        attn, v,
        dimension_numbers=(((1,), (0,)), ((), ())),
        preferred_element_type=jnp.float32)        # (TQ, Dv_pad)

    attn_ref[0] = attn
    ctx_ref[0] = ctx.astype(ctx_ref.dtype)


def _round_up(x, m):
    return ((x + m - 1) // m) * m


def _vmem_capacity_bytes():
    """Per-core VMEM capacity (generation-aware: 128 MiB v5e/v6e, 64 MiB v7x)."""
    try:
        cap = int(pltpu.get_tpu_info().vmem_capacity_bytes)
        if cap > 0:
            return cap
    except Exception:
        pass
    return 64 << 20        # conservative fallback, safe on every generation


def _vmem_estimate(tq, lk, d, dv_pad, itemsize, exp_itemsize, kv_buffers):
    """Rough upper bound on the kernel's VMEM footprint in bytes."""
    kv_resident = kv_buffers * lk * (d + dv_pad) * itemsize      # K + V blocks
    q_blocks = 2 * tq * d * itemsize                             # q double-buffered
    out_blocks = 2 * tq * (dv_pad + lk) * itemsize               # ctx + attn blocks
    temps = tq * lk * (4 + exp_itemsize + itemsize) + 4 * tq * dv_pad
    return kv_resident + q_blocks + out_blocks + temps


def _pick_tq(lq, lk, d, dv_pad, itemsize, exp_itemsize, min_mult, budget):
    """Largest legal query tile whose (single-buffered K/V) footprint fits."""
    lq_pad_unit = _round_up(lq, min_mult)
    cands = sorted({min(t, lq_pad_unit)
                    for t in (512, 256, 128, 64, 32, 16, 8)
                    if t % min_mult == 0}, reverse=True)
    for tq in cands:
        if _vmem_estimate(tq, lk, d, dv_pad, itemsize, exp_itemsize, 1) <= budget:
            return tq
    # TODO(synk): very long Lk needs a flash-style kernel (Lk tiled as an
    # "arbitrary" grid axis with online-softmax accumulators); refuse rather
    # than silently under-provision vmem_limit_bytes.
    raise ValueError(
        f"ScaledDotProductAttention kernel does not fit in VMEM even at the "
        f"smallest query tile (Lk={lk}, D={d}, Dv_pad={dv_pad}, "
        f"budget={budget} B); a flash-style Lk-tiled kernel is required.")


def scaled_dot_product_attention(q, k, v, scale=None, attn_mask=None,
                                 attention_dropout=0.0):
    """Returns (context, attention), matching the PyTorch module's forward.

    `attn_mask` is accepted for signature parity but, exactly like the
    reference forward, it is never applied.
    """
    del attn_mask  # unused in the reference module's forward
    if attention_dropout:
        # TODO(synk): nonzero dropout needs in-kernel PRNG (prng_seed +
        # stateful_bernoulli); p=0.0 (the module default) is the identity.
        raise NotImplementedError("attention_dropout > 0 not implemented")

    B, Lq, D = q.shape
    Bk, Lk, Dk = k.shape
    Bv, Lkv, Dv = v.shape
    assert (B, D) == (Bk, Dk) and (B, Lk) == (Bv, Lkv)

    out_dtype = q.dtype
    itemsize = jnp.dtype(q.dtype).itemsize
    exp_dtype = jnp.bfloat16 if q.dtype == jnp.bfloat16 else jnp.float32
    exp_itemsize = jnp.dtype(exp_dtype).itemsize
    # Sublane-packing granule: 16 rows for 2-byte dtypes, 8 for 4-byte.
    min_mult = 16 if itemsize == 2 else 8

    # Lane-dense context output: pad Dv up to 128 so the ctx store is an
    # unmasked vst (padded V columns are zero -> padded ctx columns are zero).
    Dv_pad = Dv if Dv >= 128 else 128
    v_p = v if Dv_pad == Dv else jnp.pad(v, ((0, 0), (0, 0), (0, Dv_pad - Dv)))

    # Generation-aware VMEM budget (~70% of per-core capacity).
    cap = _vmem_capacity_bytes()
    budget = int(cap * 0.70)
    TQ = _pick_tq(Lq, Lk, D, Dv_pad, itemsize, exp_itemsize, min_mult, budget)

    # Pad Lq to a TQ multiple (padded query rows are independent and finite;
    # they are sliced off below) instead of a whole-Lq fallback tile.
    Lq_pad = _round_up(Lq, TQ)
    q_p = q if Lq_pad == Lq else jnp.pad(q, ((0, 0), (0, Lq_pad - Lq), (0, 0)))
    n_q_tiles = Lq_pad // TQ

    kernel = functools.partial(_sdpa_kernel, scale=scale, exp_dtype=exp_dtype)

    def build(single_buffer_kv):
        kv_buffers = 1 if single_buffer_kv else 2
        kv_kwargs = ({"pipeline_mode": pl.Buffered(1)}
                     if single_buffer_kv else {})
        est = _vmem_estimate(TQ, Lk, D, Dv_pad, itemsize, exp_itemsize,
                             kv_buffers)
        vmem_limit = int(min(cap, max(est + (2 << 20), 32 << 20)))
        grid_spec = pltpu.PrefetchScalarGridSpec(
            num_scalar_prefetch=0,
            grid=(B, n_q_tiles),
            in_specs=[
                pl.BlockSpec((1, TQ, D), lambda b, i: (b, i, 0)),
                # K/V ignore the query-tile axis -> resident across it.
                pl.BlockSpec((1, Lk, D), lambda b, i: (b, 0, 0), **kv_kwargs),
                pl.BlockSpec((1, Lk, Dv_pad), lambda b, i: (b, 0, 0),
                             **kv_kwargs),
            ],
            out_specs=[
                pl.BlockSpec((1, TQ, Dv_pad), lambda b, i: (b, i, 0)),
                pl.BlockSpec((1, TQ, Lk), lambda b, i: (b, i, 0)),
            ],
        )
        return pl.pallas_call(
            kernel,
            out_shape=(
                jax.ShapeDtypeStruct((B, Lq_pad, Dv_pad), out_dtype),
                jax.ShapeDtypeStruct((B, Lq_pad, Lk), out_dtype),
            ),
            grid_spec=grid_spec,
            compiler_params=pltpu.CompilerParams(
                # Batch is the leading "parallel" axis (megacore sharding).
                dimension_semantics=("parallel", "parallel"),
                vmem_limit_bytes=vmem_limit),
        )

    try_single = hasattr(pl, "Buffered")
    try:
        ctx_p, attn_p = build(try_single)(q_p, k, v_p)
    except Exception:
        if not try_single:
            raise
        # Fall back to default double-buffered K/V.
        ctx_p, attn_p = build(False)(q_p, k, v_p)

    context = ctx_p[:, :Lq, :Dv]
    attention = attn_p[:, :Lq, :]
    return context, attention


def _reference(q, k, v, scale=None):
    qf, kf, vf = (x.astype(jnp.float32) for x in (q, k, v))
    s = jnp.einsum("bqd,bkd->bqk", qf, kf)
    if scale:
        s = s * scale
    attn = jax.nn.softmax(s, axis=-1)
    ctx = jnp.einsum("bqk,bkd->bqd", attn, vf)
    return ctx, attn


if __name__ == "__main__":
    key = jax.random.PRNGKey(0)
    kq, kk, kv_, kq2, kk2, kv2 = jax.random.split(key, 6)

    # --- f32 correctness check (small shapes consistent with the module) ---
    B, Lq, Lk, D, Dv = 2, 8, 8, 32, 32
    q = jax.random.normal(kq, (B, Lq, D), dtype=jnp.float32)
    k = jax.random.normal(kk, (B, Lk, D), dtype=jnp.float32)
    v = jax.random.normal(kv_, (B, Lk, Dv), dtype=jnp.float32)
    scale = 1.0 / math.sqrt(D)

    ctx, attn = scaled_dot_product_attention(q, k, v, scale=scale)
    jax.block_until_ready(ctx)
    jax.block_until_ready(attn)

    ctx_ref, attn_ref = _reference(q, k, v, scale=scale)
    assert ctx.shape == (B, Lq, Dv) and attn.shape == (B, Lq, Lk)
    assert jnp.allclose(attn, attn_ref, atol=1e-4, rtol=1e-4), \
        float(jnp.max(jnp.abs(attn - attn_ref)))
    assert jnp.allclose(ctx, ctx_ref, atol=1e-4, rtol=1e-4), \
        float(jnp.max(jnp.abs(ctx - ctx_ref)))

    # --- bf16 smoke test: exercises bf16 MXU/EUP path, Lq padding, Dv pad ---
    B2, Lq2, Lk2, D2, Dv2 = 2, 24, 128, 64, 64
    q2 = jax.random.normal(kq2, (B2, Lq2, D2), dtype=jnp.bfloat16)
    k2 = jax.random.normal(kk2, (B2, Lk2, D2), dtype=jnp.bfloat16)
    v2 = jax.random.normal(kv2, (B2, Lk2, Dv2), dtype=jnp.bfloat16)
    scale2 = 1.0 / math.sqrt(D2)

    ctx2, attn2 = scaled_dot_product_attention(q2, k2, v2, scale=scale2)
    jax.block_until_ready(ctx2)
    jax.block_until_ready(attn2)

    ctx2_ref, attn2_ref = _reference(q2, k2, v2, scale=scale2)
    assert ctx2.shape == (B2, Lq2, Dv2) and attn2.shape == (B2, Lq2, Lk2)
    assert jnp.allclose(attn2.astype(jnp.float32), attn2_ref,
                        atol=2e-2, rtol=2e-2), \
        float(jnp.max(jnp.abs(attn2.astype(jnp.float32) - attn2_ref)))
    assert jnp.allclose(ctx2.astype(jnp.float32), ctx2_ref,
                        atol=4e-2, rtol=4e-2), \
        float(jnp.max(jnp.abs(ctx2.astype(jnp.float32) - ctx2_ref)))

    print("KERNEL_OK")
</pallas_src>

<mosaic_0001>
module attributes {stable_mosaic.version = 11 : i64} {
  func.func @_sdpa_kernel(%arg0: i32, %arg1: i32, %arg2: memref<1x8x32xf32, #tpu.memory_space<vmem>>, %arg3: memref<1x8x32xf32, #tpu.memory_space<vmem>>, %arg4: memref<1x8x128xf32, #tpu.memory_space<vmem>>, %arg5: memref<1x8x128xf32, #tpu.memory_space<vmem>>, %arg6: memref<1x8x8xf32, #tpu.memory_space<vmem>>) attributes {dimension_semantics = [#tpu.dimension_semantics<parallel>, #tpu.dimension_semantics<parallel>], iteration_bounds = array<i64: 2, 1>, scalar_prefetch = 0 : i64, scratch_operands = 0 : i64, tpu.core_type = #tpu.core_type<tc>, window_params = [{transform_indices = @transform_0, window_bounds = array<i64: 1, 8, 32>}, {pipeline_mode = #tpu.pipeline_mode<synchronous>, transform_indices = @transform_1, window_bounds = array<i64: 1, 8, 32>}, {pipeline_mode = #tpu.pipeline_mode<synchronous>, transform_indices = @transform_2, window_bounds = array<i64: 1, 8, 128>}, {transform_indices = @transform_3, window_bounds = array<i64: 1, 8, 128>}, {transform_indices = @transform_4, window_bounds = array<i64: 1, 8, 8>}]} {
    %c0 = arith.constant 0 : index
    %c0_0 = arith.constant 0 : index
    %c0_1 = arith.constant 0 : index
    %0 = vector.load %arg2[%c0, %c0_0, %c0_1] : memref<1x8x32xf32, #tpu.memory_space<vmem>>, vector<1x8x32xf32>
    %1 = vector.shape_cast %0 : vector<1x8x32xf32> to vector<8x32xf32>
    %c0_2 = arith.constant 0 : index
    %c0_3 = arith.constant 0 : index
    %c0_4 = arith.constant 0 : index
    %2 = vector.load %arg3[%c0_2, %c0_3, %c0_4] : memref<1x8x32xf32, #tpu.memory_space<vmem>>, vector<1x8x32xf32>
    %3 = vector.shape_cast %2 : vector<1x8x32xf32> to vector<8x32xf32>
    %c0_5 = arith.constant 0 : index
    %c0_6 = arith.constant 0 : index
    %c0_7 = arith.constant 0 : index
    %4 = vector.load %arg4[%c0_5, %c0_6, %c0_7] : memref<1x8x128xf32, #tpu.memory_space<vmem>>, vector<1x8x128xf32>
    %5 = vector.shape_cast %4 : vector<1x8x128xf32> to vector<8x128xf32>
    %cst = arith.constant 0.176776692 : f32
    %6 = vector.broadcast %cst : f32 to vector<8x32xf32>
    %7 = arith.mulf %1, %6 : vector<8x32xf32>
    %cst_8 = arith.constant dense<0.000000e+00> : vector<8x8xf32>
    %8 = tpu.matmul %7, %3, %cst_8 {dimension_numbers = #tpu.dot_dimension_numbers<[1], [1], [0], [0], [0, 0, 1, 0], [], []>} : vector<8x32xf32>, vector<8x32xf32>, vector<8x8xf32> -> vector<8x8xf32>
    %cst_9 = arith.constant dense<0xFF800000> : vector<8xf32>
    %9 = vector.multi_reduction <maximumf>, %8, %cst_9 [1] : vector<8x8xf32> to vector<8xf32>
    %10 = vector.shape_cast %9 : vector<8xf32> to vector<8x1xf32>
    %11 = vector.broadcast %10 : vector<8x1xf32> to vector<8x8xf32>
    %12 = arith.subf %8, %11 : vector<8x8xf32>
    %13 = math.exp %12 : vector<8x8xf32>
    %cst_10 = arith.constant dense<0.000000e+00> : vector<8xf32>
    %14 = vector.multi_reduction <add>, %13, %cst_10 [1] : vector<8x8xf32> to vector<8xf32>
    %15 = vector.shape_cast %14 : vector<8xf32> to vector<8x1xf32>
    %16 = tpu.reciprocal %15 : vector<8x1xf32> -> vector<8x1xf32>
    %17 = vector.broadcast %16 : vector<8x1xf32> to vector<8x8xf32>
    %18 = arith.mulf %13, %17 : vector<8x8xf32>
    %cst_11 = arith.constant dense<0.000000e+00> : vector<8x128xf32>
    %19 = tpu.matmul %18, %5, %cst_11 {dimension_numbers = #tpu.dot_dimension_numbers<[1], [0], [0], [1], [0, 0, 1, 1], [], []>} : vector<8x8xf32>, vector<8x128xf32>, vector<8x128xf32> -> vector<8x128xf32>
    %c0_12 = arith.constant 0 : index
    %c0_13 = arith.constant 0 : index
    %c0_14 = arith.constant 0 : index
    %20 = vector.load %arg6[%c0_12, %c0_13, %c0_14] : memref<1x8x8xf32, #tpu.memory_space<vmem>>, vector<1x8x8xf32>
    %21 = vector.shape_cast %20 : vector<1x8x8xf32> to vector<8x8xf32>
    %22 = vector.shape_cast %18 : vector<8x8xf32> to vector<1x8x8xf32>
    tpu.vector_store %arg6[%c0_12, %c0_13, %c0_14], %22 {strides = array<i32>} : memref<1x8x8xf32, #tpu.memory_space<vmem>>, vector<1x8x8xf32>,
    %c0_15 = arith.constant 0 : index
    %c0_16 = arith.constant 0 : index
    %c0_17 = arith.constant 0 : index
    %23 = vector.load %arg5[%c0_15, %c0_16, %c0_17] : memref<1x8x128xf32, #tpu.memory_space<vmem>>, vector<1x8x128xf32>
    %24 = vector.shape_cast %23 : vector<1x8x128xf32> to vector<8x128xf32>
    %25 = vector.shape_cast %19 : vector<8x128xf32> to vector<1x8x128xf32>
    tpu.vector_store %arg5[%c0_15, %c0_16, %c0_17], %25 {strides = array<i32>} : memref<1x8x128xf32, #tpu.memory_space<vmem>>, vector<1x8x128xf32>,
    return
  }
  func.func @transform_0(%arg0: i32, %arg1: i32) -> (i32, i32, i32) {
    %c0_i32 = arith.constant 0 : i32
    %c0_i32_0 = arith.constant 0 : i32
    return %arg0, %arg1, %c0_i32 : i32, i32, i32
  }
  func.func @transform_1(%arg0: i32, %arg1: i32) -> (i32, i32, i32) {
    %c0_i32 = arith.constant 0 : i32
    %c0_i32_0 = arith.constant 0 : i32
    %c0_i32_1 = arith.constant 0 : i32
    return %arg0, %c0_i32, %c0_i32_0 : i32, i32, i32
  }
  func.func @transform_2(%arg0: i32, %arg1: i32) -> (i32, i32, i32) {
    %c0_i32 = arith.constant 0 : i32
    %c0_i32_0 = arith.constant 0 : i32
    %c0_i32_1 = arith.constant 0 : i32
    return %arg0, %c0_i32, %c0_i32_0 : i32, i32, i32
  }
  func.func @transform_3(%arg0: i32, %arg1: i32) -> (i32, i32, i32) {
    %c0_i32 = arith.constant 0 : i32
    %c0_i32_0 = arith.constant 0 : i32
    return %arg0, %arg1, %c0_i32 : i32, i32, i32
  }
  func.func @transform_4(%arg0: i32, %arg1: i32) -> (i32, i32, i32) {
    %c0_i32 = arith.constant 0 : i32
    %c0_i32_0 = arith.constant 0 : i32
    return %arg0, %arg1, %c0_i32 : i32, i32, i32
  }
}

module attributes {stable_mosaic.version = 11 : i64} {
  func.func @_sdpa_kernel(%arg0: i32, %arg1: i32, %arg2: memref<1x8x32xf32, #tpu.memory_space<vmem>>, %arg3: memref<1x8x32xf32, #tpu.memory_space<vmem>>, %arg4: memref<1x8x128xf32, #tpu.memory_space<vmem>>, %arg5: memref<1x8x128xf32, #tpu.memory_space<vmem>>, %arg6: memref<1x8x8xf32, #tpu.memory_space<vmem>>) attributes {dimension_semantics = [#tpu.dimension_semantics<parallel>, #tpu.dimension_semantics<parallel>], iteration_bounds = array<i64: 2, 1>, scalar_prefetch = 0 : i64, scratch_operands = 0 : i64, tpu.core_type = #tpu.core_type<tc>, window_params = [{transform_indices = @transform_0, window_bounds = array<i64: 1, 8, 32>}, {transform_indices = @transform_1, window_bounds = array<i64: 1, 8, 32>}, {transform_indices = @transform_2, window_bounds = array<i64: 1, 8, 128>}, {transform_indices = @transform_3, window_bounds = array<i64: 1, 8, 128>}, {transform_indices = @transform_4, window_bounds = array<i64: 1, 8, 8>}]} {
    %c0 = arith.constant 0 : index
    %c0_0 = arith.constant 0 : index
    %c0_1 = arith.constant 0 : index
    %0 = vector.load %arg2[%c0, %c0_0, %c0_1] : memref<1x8x32xf32, #tpu.memory_space<vmem>>, vector<1x8x32xf32>
    %1 = vector.shape_cast %0 : vector<1x8x32xf32> to vector<8x32xf32>
    %c0_2 = arith.constant 0 : index
    %c0_3 = arith.constant 0 : index
    %c0_4 = arith.constant 0 : index
    %2 = vector.load %arg3[%c0_2, %c0_3, %c0_4] : memref<1x8x32xf32, #tpu.memory_space<vmem>>, vector<1x8x32xf32>
    %3 = vector.shape_cast %2 : vector<1x8x32xf32> to vector<8x32xf32>
    %c0_5 = arith.constant 0 : index
    %c0_6 = arith.constant 0 : index
    %c0_7 = arith.constant 0 : index
    %4 = vector.load %arg4[%c0_5, %c0_6, %c0_7] : memref<1x8x128xf32, #tpu.memory_space<vmem>>, vector<1x8x128xf32>
    %5 = vector.shape_cast %4 : vector<1x8x128xf32> to vector<8x128xf32>
    %cst = arith.constant 0.176776692 : f32
    %6 = vector.broadcast %cst : f32 to vector<8x32xf32>
    %7 = arith.mulf %1, %6 : vector<8x32xf32>
    %cst_8 = arith.constant dense<0.000000e+00> : vector<8x8xf32>
    %8 = tpu.matmul %7, %3, %cst_8 {dimension_numbers = #tpu.dot_dimension_numbers<[1], [1], [0], [0], [0, 0, 1, 0], [], []>} : vector<8x32xf32>, vector<8x32xf32>, vector<8x8xf32> -> vector<8x8xf32>
    %cst_9 = arith.constant dense<0xFF800000> : vector<8xf32>
    %9 = vector.multi_reduction <maximumf>, %8, %cst_9 [1] : vector<8x8xf32> to vector<8xf32>
    %10 = vector.shape_cast %9 : vector<8xf32> to vector<8x1xf32>
    %11 = vector.broadcast %10 : vector<8x1xf32> to vector<8x8xf32>
    %12 = arith.subf %8, %11 : vector<8x8xf32>
    %13 = math.exp %12 : vector<8x8xf32>
    %cst_10 = arith.constant dense<0.000000e+00> : vector<8xf32>
    %14 = vector.multi_reduction <add>, %13, %cst_10 [1] : vector<8x8xf32> to vector<8xf32>
    %15 = vector.shape_cast %14 : vector<8xf32> to vector<8x1xf32>
    %16 = tpu.reciprocal %15 : vector<8x1xf32> -> vector<8x1xf32>
    %17 = vector.broadcast %16 : vector<8x1xf32> to vector<8x8xf32>
    %18 = arith.mulf %13, %17 : vector<8x8xf32>
    %cst_11 = arith.constant dense<0.000000e+00> : vector<8x128xf32>
    %19 = tpu.matmul %18, %5, %cst_11 {dimension_numbers = #tpu.dot_dimension_numbers<[1], [0], [0], [1], [0, 0, 1, 1], [], []>} : vector<8x8xf32>, vector<8x128xf32>, vector<8x128xf32> -> vector<8x128xf32>
    %c0_12 = arith.constant 0 : index
    %c0_13 = arith.constant 0 : index
    %c0_14 = arith.constant 0 : index
    %20 = vector.load %arg6[%c0_12, %c0_13, %c0_14] : memref<1x8x8xf32, #tpu.memory_space<vmem>>, vector<1x8x8xf32>
    %21 = vector.shape_cast %20 : vector<1x8x8xf32> to vector<8x8xf32>
    %22 = vector.shape_cast %18 : vector<8x8xf32> to vector<1x8x8xf32>
    tpu.vector_store %arg6[%c0_12, %c0_13, %c0_14], %22 {strides = array<i32>} : memref<1x8x8xf32, #tpu.memory_space<vmem>>, vector<1x8x8xf32>,
    %c0_15 = arith.constant 0 : index
    %c0_16 = arith.constant 0 : index
    %c0_17 = arith.constant 0 : index
    %23 = vector.load %arg5[%c0_15, %c0_16, %c0_17] : memref<1x8x128xf32, #tpu.memory_space<vmem>>, vector<1x8x128xf32>
    %24 = vector.shape_cast %23 : vector<1x8x128xf32> to vector<8x128xf32>
    %25 = vector.shape_cast %19 : vector<8x128xf32> to vector<1x8x128xf32>
    tpu.vector_store %arg5[%c0_15, %c0_16, %c0_17], %25 {strides = array<i32>} : memref<1x8x128xf32, #tpu.memory_space<vmem>>, vector<1x8x128xf32>,
    return
  }
  func.func @transform_0(%arg0: i32, %arg1: i32) -> (i32, i32, i32) {
    %c0_i32 = arith.constant 0 : i32
    %c0_i32_0 = arith.constant 0 : i32
    return %arg0, %arg1, %c0_i32 : i32, i32, i32
  }
  func.func @transform_1(%arg0: i32, %arg1: i32) -> (i32, i32, i32) {
    %c0_i32 = arith.constant 0 : i32
    %c0_i32_0 = arith.constant 0 : i32
    %c0_i32_1 = arith.constant 0 : i32
    return %arg0, %c0_i32, %c0_i32_0 : i32, i32, i32
  }
  func.func @transform_2(%arg0: i32, %arg1: i32) -> (i32, i32, i32) {
    %c0_i32 = arith.constant 0 : i32
    %c0_i32_0 = arith.constant 0 : i32
    %c0_i32_1 = arith.constant 0 : i32
    return %arg0, %c0_i32, %c0_i32_0 : i32, i32, i32
  }
  func.func @transform_3(%arg0: i32, %arg1: i32) -> (i32, i32, i32) {
    %c0_i32 = arith.constant 0 : i32
    %c0_i32_0 = arith.constant 0 : i32
    return %arg0, %arg1, %c0_i32 : i32, i32, i32
  }
  func.func @transform_4(%arg0: i32, %arg1: i32) -> (i32, i32, i32) {
    %c0_i32 = arith.constant 0 : i32
    %c0_i32_0 = arith.constant 0 : i32
    return %arg0, %arg1, %c0_i32 : i32, i32, i32
  }
}

</mosaic_0001>

<bundles_post_ra>
// kernel: tpu_custom_call.1
= control target key start
LH: loop header
LB: loop body
LE: loop exit
PB: predicated region body
PF: predicated region fallthrough
CT: control target
= control target key end

     0   :  { %10 = vsyncpa [#allocation3], 0  ;;  %s1263_s0 = inlined_call_operand.hbm [shape: f32[2,8,32], index: 0, kind: input, shape index: {}]   ;;  %s1264_s1 = inlined_call_operand.hbm [shape: f32[2,8,32], index: 1, kind: input, shape index: {}]   ;;  %s1265_s2 = inlined_call_operand.hbm [shape: f32[2,8,128], index: 2, kind: input, shape index: {}]   ;;  %s1266_s3 = inlined_call_operand.hbm [shape: f32[2,8,128], index: 3, kind: output, shape index: {0}]   ;;  %s1267_s4 = inlined_call_operand.hbm [shape: f32[2,8,8], index: 4, kind: output, shape index: {1}]  }
   0x1   :  { %12 = vsyncpa [#allocation3 + $0x1], 0 }
   0x2   :  { %13 = vsyncpa [#allocation6], 0 }
   0x3   :  { %14 = vsyncpa [#allocation4], 0 }
   0x4   :  { %16 = vsyncpa [#allocation4 + $0x1], 0 }
   0x5   :  { %17 = vsyncpa [#allocation10], 0 }
   0x6   :  { %19 = vsyncpa [#allocation10 + $0x1], 0  ;;  %s983_s15 = smov 0   ;;  %s985_s16 = smov 0  }
   0x7   :  { %s987_s17 = smov 0   ;;  %s989_s18 = smov 0  }
   0x8   :  { %s991_s19 = smov 0   ;;  %s993_s20 = smov 0  }
   0x9 LB: > { %s620_s21 = sadd.s32 4294967295, %s949_s20   ;;  %s621_s22 = sadd.s32 4294967294, %s949_s20   ;;  %s949_s20 = sphi %s993_s20, %s25_s20   ;;  %s945_s19 = sphi %s991_s19, %s1287_s19   ;;  %s941_s18 = sphi %s989_s18, %s1286_s18   ;;  %s937_s17 = sphi %s987_s17, %s1285_s17   ;;  %s933_s16 = sphi %s985_s16, %s1284_s16   ;;  %s929_s15 = sphi %s983_s15, %s1283_s15  }
   0xa   : > { %p59_p0 = scmp.ne.s32.totalorder %s933_s16, %s929_s15  ;;  %p60_p1 = scmp.eq.s32.totalorder %s620_s21, 0 }
   0xb   : > { %p1015_p2 = scmp.eq.s32.totalorder %s620_s21, 1  ;;  %p143_p3 = scmp.eq.s32.totalorder %s621_s22, 1 }
   0xc   : > { %p1019_p4 = por %p60_p1, %p59_p0  ;;  %p622_p5 = scmp.ge.s32.totalorder %s949_s20, 1 }
   0xd   : > { %s1271_s23 = scalar_select %p1015_p2, 1, 0 }
   0xe   : > { %s1272_s24 = scalar_select %p1019_p4, 1, 0 }
   0xf   : > { %p1024_p6 = por %p143_p3, %p59_p0  ;;  %p178_p7 = scmp.lt.s32.totalorder %s949_s20, 3 }
  0x10   : > { %s1029_s26 = sshll.u32 %s941_s18, 7  ;;  %s951_s5 = smov [#allocation5]  }
  0x11   : > { %s1273_s25 = scalar_select %p1024_p6, 1, 0 }
  0x12   : > { %p1031_p8 = pnand %p622_p5, %p178_p7  ;;  %s1039_s30 = scalar_lea.hbm %s1264_s1, %s1029_s26 }
  0x13   : > { %s193_s6 = sshll.u32 %s951_s5, 4  ;;  %s1048_s9 = scalar_lea.hbm %s1265_s2, %s1029_s26  ;;  %s194_s6 = int_to_ptr.vmem [resolvable:$true] %s193_s6 }
  0x14   : > { %s1274_s27 = scalar_select %p1031_p8, 1, 0 }
  0x15   : > { %p665_p10 = pneg %p1031_p8  ;;  %s952_s11 = smov [#allocation7]  }
  0x16   : > { %s206_s12 = sshll.u32 %s952_s11, 4  ;;  %s741_s13 = scalar_lea.hbm %s1039_s30, 128  ;;  %s1056_s12 = int_to_ptr.vmem [resolvable:$true] %s206_s12 }
  0x17   : > { %p1052_p11 = pnand %p665_p10, %p1019_p4  ;;  %p742_p12 = scmp.ne.s32.totalorder %s1039_s30, %s741_s13 }
  0x18   : > { %s746_s21 = scalar_lea.hbm %s1264_s1, 256  ;;  %p747_p3 = scmp.lt.u32.totalorder %s1039_s30, %s1264_s1 }
  0x19   : > { %p743_p13 = pneg %p1052_p11  ;;  %p748_p5 = scmp.lt.u32.totalorder %s746_s21, %s741_s13 }
  0x1a   : > { %p750_p10 = scmp.lt.u32.totalorder %s741_s13, %s1039_s30 }
  0x1b   : > { %p744_p0 = pnand %p743_p13, %p742_p12  ;;  %p749_p7 = por %p748_p5, %p747_p3 }
  0x1d   : > { %p745_p1 = pneg %p744_p0  ;;  %p751_p9 = por %p750_p10, %p749_p7 }
  0x1f   : > { %p752_p6 = pnand %p751_p9, %p745_p1 }
  0x21   : > { %755 = shalt.err (!%p752_p6)
}
  0x22   : > { %s756_s29 = scalar_lea.vmem %s194_s6, 128  ;;  %p764_p8 = scmp.lt.s32.totalorder %s194_s6, %s194_s6 }
  0x23   : > { %p757_p4 = scmp.ne.s32.totalorder %s194_s6, %s756_s29  ;;  %p765_p2 = scmp.lt.s32.totalorder %s756_s29, %s756_s29 }
  0x25   : > { %p759_p12 = pnand %p757_p4, %p743_p13  ;;  %p766_p3 = por %p765_p2, %p764_p8 }
  0x27   : > { %p760_p0 = pneg %p759_p12 }
  0x29   : > { %p767_p5 = pnand %p766_p3, %p760_p0 }
  0x2b   : > { %770 = shalt.err (!%p767_p5)
}
  0x2c   : > { %668 = dma.hbm_to_vmem [thread:$0]  (!%p1052_p11), %s1039_s30, 128, %s194_s6, [#allocation6]  }
  0x2d   : > { %s771_s5 = scalar_lea.hbm %s1048_s9, 128  ;;  %s776_s11 = scalar_lea.hbm %s1265_s2, 256 }
  0x2e   : > { %p772_p6 = scmp.ne.s32.totalorder %s1048_s9, %s771_s5  ;;  %p777_p2 = scmp.lt.u32.totalorder %s1048_s9, %s1265_s2 }
  0x2f   : > { %p778_p8 = scmp.lt.u32.totalorder %s776_s11, %s771_s5  ;;  %p780_p7 = scmp.lt.u32.totalorder %s771_s5, %s1048_s9 }
  0x30   : > { %p774_p4 = pnand %p772_p6, %p743_p13 }
  0x31   : > { %p779_p1 = por %p778_p8, %p777_p2 }
  0x32   : > { %p775_p9 = pneg %p774_p4 }
  0x33   : > { %p781_p10 = por %p780_p7, %p779_p1 }
  0x35   : > { %p782_p12 = pnand %p781_p10, %p775_p9 }
  0x37   : > { %785 = shalt.err (!%p782_p12)
}
  0x38   : > { %s786_s30 = scalar_lea.vmem %s1056_s12, 128  ;;  %p794_p6 = scmp.lt.s32.totalorder %s1056_s12, %s1056_s12 }
  0x39   : > { %p787_p0 = scmp.ne.s32.totalorder %s1056_s12, %s786_s30  ;;  %p795_p4 = scmp.lt.s32.totalorder %s786_s30, %s786_s30 }
  0x3b   : > { %p789_p3 = pnand %p787_p0, %p743_p13  ;;  %p796_p2 = por %p795_p4, %p794_p6 }
  0x3d   : > { %p790_p5 = pneg %p789_p3 }
  0x3f   : > { %p797_p8 = pnand %p796_p2, %p790_p5 }
  0x41   : > { %800 = shalt.err (!%p797_p8)
}
  0x42   : > { %671 = dma.hbm_to_vmem [thread:$0]  (!%p1052_p11), %s1048_s9, 128, %s1056_s12, [#allocation6]  }
  0x43   : > { %s37_s6 = sadd.s32 1, %s945_s19  ;;  %s46_s18 = sadd.s32 1, %s937_s17 }
  0x44   : > { %p39_p13 = scmp.ge.s32.totalorder %s37_s6, 2  ;;  %p53_p9 = scmp.ne.s32.totalorder %s937_s17, %s933_s16 }
  0x45   : > { %p54_p1 = scmp.eq.s32.totalorder %s949_s20, 0  ;;  %p683_p7 = scmp.lt.s32.totalorder %s949_s20, 2 }
  0x46   : > { %s1289_s6 = smov (%p39_p13, %s37_s6), 0  ;;  %p1276_p12 = scmp.ne.s32.totalorder %s1271_s23, 0 }
  0x47   : > { %p55_p10 = por %p54_p1, %p53_p9  ;;  %s41_s21 = ssub.s32 %s945_s19, %s1289_s6 }
  0x48   : > { %p1113_p0 = por %p1276_p12, %p53_p9  ;;  %s217_s22 = sand.u32 1, %s937_s17  }
  0x49   : > { %p44_p3 = scmp.eq.s32.totalorder %s41_s21, 0  ;;  %s626_s9 = sshll.u32 %s217_s22, 3 }
  0x4a   : > { %s627_s12 = sshll.u32 %s945_s19, 7  ;;  %s221_s23 = scalar_lea.vmem [#allocation2], %s626_s9 }
  0x4b   : > { %s1122_s28 = scalar_select %p44_p3, %s937_s17, %s46_s18  }
  0x4c   : > { %s1127_s7 = scalar_lea.hbm %s1263_s0, %s627_s12  ;;  %s229_s8 = sshll.u32 %s221_s23, 4  ;;  %s1135_s8 = int_to_ptr.vmem [resolvable:$true] %s229_s8 }
  0x4d   : > { %p1131_p11 = pnand %p683_p7, %p55_p10  ;;  %s218_s13 = scalar_lea.sflag [#allocation3], %s217_s22 }
  0x4e   : > { %s801_s14 = scalar_lea.hbm %s1127_s7, 128  ;;  %s806_s21 = scalar_lea.hbm %s1263_s0, 256 }
  0x4f   : > { %p802_p5 = scmp.ne.s32.totalorder %s1127_s7, %s801_s14  ;;  %p803_p6 = pneg %p1131_p11 }
  0x50   : > { %p807_p8 = scmp.lt.u32.totalorder %s1127_s7, %s1263_s0  ;;  %p808_p13 = scmp.lt.u32.totalorder %s806_s21, %s801_s14 }
  0x51   : > { %p804_p4 = pnand %p803_p6, %p802_p5  ;;  %p810_p1 = scmp.lt.u32.totalorder %s801_s14, %s1127_s7 }
  0x52   : > { %p809_p9 = por %p808_p13, %p807_p8 }
  0x53   : > { %p805_p2 = pneg %p804_p4 }
  0x54   : > { %p811_p7 = por %p810_p1, %p809_p9 }
  0x56   : > { %p812_p10 = pnand %p811_p7, %p805_p2 }
  0x58   : > { %815 = shalt.err (!%p812_p10)
}
  0x59   : > { %s816_s22 = scalar_lea.vmem %s1135_s8, 128  ;;  %s953_s29 = smov [#allocation2]  }
  0x5a   : > { %p817_p12 = scmp.ne.s32.totalorder %s1135_s8, %s816_s22  ;;  %s821_s5 = sshll.u32 %s953_s29, 4  ;;  %s822_s5 = int_to_ptr.vmem [resolvable:$false] %s821_s5 }
  0x5b   : > { %s823_s23 = scalar_lea.vmem %s822_s5, 256  ;;  %p824_p4 = scmp.lt.s32.totalorder %s1135_s8, %s822_s5 }
  0x5c   : > { %p819_p3 = pnand %p817_p12, %p803_p6  ;;  %p825_p8 = scmp.lt.s32.totalorder %s823_s23, %s816_s22 }
  0x5e   : > { %p820_p5 = pneg %p819_p3  ;;  %p826_p13 = por %p825_p8, %p824_p4 }
  0x60   : > { %p827_p9 = pnand %p826_p13, %p820_p5 }
  0x62   : > { %830 = shalt.err (!%p827_p9)
}
  0x63   : > { %675 = dma.hbm_to_vmem [thread:$0]  (!%p1131_p11), %s1127_s7, 128, %s1135_s8, %s218_s13  }
  0x64   : > { %p1279_p2 = scmp.ne.s32.totalorder %s1274_s27, 0 }
  0x65   : > { %s1165_s14 = sand.u32 (!%p1279_p2), 1, %s933_s16   ;;  %p1280_p6 = scmp.ne.s32.totalorder (!%p1279_p2), %s1272_s24, 0 }
  0x66   : > { %238 = sbr.rel (%p1279_p2) target bundleno = 870 (0x366), region = 32  ;;  %s1168_s30 = sshll.u32 (!%p1279_p2), %s1165_s14, 3 }
  0x67   : > { %s241_s18 = scalar_lea.sflag (!%p1279_p2), [#allocation3], %s1165_s14  ;;  %s244_s21 = scalar_lea.vmem (!%p1279_p2), [#allocation2], %s1168_s30 }
  0x6d   : > { %912 = dma.done.wait (%p1280_p6), %s241_s18, 128  }
  0x6e   : > { %914 = vsyncadd (%p1280_p6), %s241_s18, 4294967168 }
  0x6f   : > { %916 = dma.done.wait (%p1280_p6), [#allocation6], 256  }
  0x70   : > { %918 = vsyncadd (%p1280_p6), [#allocation6], 4294967040  ;;  %v954_v0 = vmov 0.0   ;;  %vm955_vm0 = vmmov 0   ;;  %vm286_vm1 = vcmask 261120   ;;  %v283_v1 = vld [vmem:[#allocation5] sm:$0xff]  ;;  %s1189_s11 = scalar_lea.hbm %s1267_s4, %s1029_s26 }
  0x71   : > { %645 = vmatprep.subr.mxu0 %v954_v0  ;;  %647 = vmatprep.mubr.msk.f32.mxu0 %vm955_vm0, %v954_v0  ;;  %v282_v2 = vld [vmem:[%s244_s21] sm:$0xff]  ;;  %vm363_vm2 = vcmask 64512   ;;  %v284_v12 = vld [vmem:[#allocation7] sm:$0xff]  ;;  %s281_s24 = scalar_lea.vmem [#allocation9], %s1168_s30  ;;  %s456_s13 = scalar_lea.sflag [#allocation10], %s1165_s14 }
  0x72   : > { %650 = vmatprep.subr.mxu1 %v954_v0  ;;  %652 = vmatprep.mubr.msk.f32.mxu1 %vm955_vm0, %v954_v0  ;;  %v285_v3 = vmul.f32 0.17677669, %v282_v2  ;;  %s484_s27 = sshll.u32 %s281_s24, 4  ;;  %s956_s12 = smov [#allocation9]   ;;  %s485_s27 = int_to_ptr.vmem [resolvable:$true] %s484_s27 }
  0x73   : > { %646 = vmatpush3.xpose.msk.msra.mxu0 %vm286_vm1, %v283_v1  ;;  %651 = vmatpush3.msra.mxu1 %v284_v12  ;;  %s831_s9 = scalar_lea.vmem %s485_s27, 128  ;;  %s835_s22 = sshll.u32 %s956_s12, 4  ;;  %s836_s22 = int_to_ptr.vmem [resolvable:$false] %s835_s22 }
  0x74   : > { %p832_p11 = scmp.ne.s32.totalorder %s485_s27, %s831_s9  ;;  %s837_s29 = scalar_lea.vmem %s836_s22, 256 }
  0x75   : > { %p838_p10 = scmp.lt.s32.totalorder %s485_s27, %s836_s22  ;;  %p839_p12 = scmp.lt.s32.totalorder %s837_s29, %s831_s9 }
  0x76   : > { %648 = vmatmul.mubr.msk.f32.vlgmr.msra.gmra.mrb[0].mxu0 %vm286_vm1, %v285_v3  ;;  %p833_p1 = pnand %p832_p11, %p1113_p0 }
  0x77   : > { %p840_p3 = por %p839_p12, %p838_p10 }
  0x78   : > { %p834_p7 = pneg %p833_p1 }
  0x7a   : > { %p841_p5 = pnand %p840_p3, %p834_p7 }
 0x149   : > { %v359_v4 = vpop.f32.mrb[0].mxu0 }
 0x14a   : > { %v649_v5 = vpop.f32.mrb[1].mxu0  ;;  %v364_v6 = vsel %vm363_vm2, %v359_v4, -inf }
 0x14b   : > { %365 = vmax.xlane.f32.xlu0 %v364_v6 }
 0x1d8   : > { %v366_v7 = vpop.xlane.xlu0 %365 }
 0x1d9   : > { %v367_v8 = vsub.f32 %v359_v4, %v366_v7 }
 0x1db   : > { %v368_v9 = vmul.f32 1.442695, %v367_v8 }
 0x1dd   : > { %737 = vpow2.f32 %v368_v9 }
 0x1e7   : > { %v738_v10 = vpop.eup %737 }
 0x1e8   : > { %v370_v11 = vsel %vm363_vm2, %v738_v10, 0.0 }
 0x1e9   : > { %371 = vadd.xlane.f32.xlu0 %v370_v11 }
 0x276   : > { %v372_v13 = vpop.xlane.xlu0 %371 }
 0x277   : > { %739 = vrcp.f32 %v372_v13 }
 0x281   : > { %v740_v14 = vpop.eup %739 }
 0x282   : > { %v374_v15 = vmul.f32 %v740_v14, %v738_v10 }
 0x284   : > { %653 = vmatmul.mubr.msk.f32.vlgmr.msra.gmra.mrb[0].mxu1 %vm363_vm2, %v374_v15  ;;  %448 = vst.msk [vmem:[%s281_s24] sm:$0xff] %vm363_vm2, %v374_v15 }
 0x285   : > { %844 = shalt.err (!%p841_p5)
}
 0x286   : > { %s845_s5 = scalar_lea.hbm %s1189_s11, 128  ;;  %s849_s21 = scalar_lea.hbm %s1267_s4, 256 }
 0x287   : > { %p846_p4 = scmp.ne.s32.totalorder %s1189_s11, %s845_s5  ;;  %p850_p9 = scmp.lt.u32.totalorder %s1189_s11, %s1267_s4 }
 0x288   : > { %p851_p2 = scmp.lt.u32.totalorder %s849_s21, %s845_s5  ;;  %p853_p11 = scmp.lt.u32.totalorder %s845_s5, %s1189_s11 }
 0x289   : > { %p847_p8 = pnand %p846_p4, %p1113_p0 }
 0x28a   : > { %p852_p6 = por %p851_p2, %p850_p9 }
 0x28b   : > { %p848_p13 = pneg %p847_p8 }
 0x28c   : > { %p854_p1 = por %p853_p11, %p852_p6 }
 0x28e   : > { %p855_p7 = pnand %p854_p1, %p848_p13 }
 0x290   : > { %858 = shalt.err (!%p855_p7)
}
 0x291   : > { %662 = dma.vmem_to_hbm [thread:$0]  (%p1113_p0), %s485_s27, 128, %s1189_s11, %s456_s13  }
 0x292   : > { %s274_s8 = scalar_lea.vmem [#allocation8], %s1168_s30  ;;  %s1216_s29 = scalar_lea.hbm %s1266_s3, %s1029_s26 }
 0x293   : > { %s470_s9 = sshll.u32 %s274_s8, 4  ;;  %s451_s5 = scalar_lea.sflag [#allocation4], %s1165_s14  ;;  %s1210_s9 = int_to_ptr.vmem [resolvable:$true] %s470_s9 }
 0x294   : > { %s859_s23 = scalar_lea.vmem %s1210_s9, 128  ;;  %s957_s30 = smov [#allocation8]  }
 0x295   : > { %p860_p10 = scmp.ne.s32.totalorder %s1210_s9, %s859_s23  ;;  %s863_s27 = sshll.u32 %s957_s30, 4  ;;  %s864_s27 = int_to_ptr.vmem [resolvable:$false] %s863_s27 }
 0x296   : > { %s865_s11 = scalar_lea.vmem %s864_s27, 256  ;;  %p866_p5 = scmp.lt.s32.totalorder %s1210_s9, %s864_s27 }
 0x297   : > { %p861_p12 = pnand %p860_p10, %p1113_p0  ;;  %p867_p4 = scmp.lt.s32.totalorder %s865_s11, %s859_s23 }
 0x299   : > { %p862_p3 = pneg %p861_p12  ;;  %p868_p8 = por %p867_p4, %p866_p5 }
 0x29b   : > { %p869_p13 = pnand %p868_p8, %p862_p3 }
 0x357   : > { %v444_v16 = vpop.f32.mrb[0].mxu1 }
 0x358   : > { %449 = vst [vmem:[%s274_s8] sm:$0xff] %v444_v16  ;;  %v654_v17 = vpop.f32.mrb[1].mxu1 }
 0x359   : > { %872 = shalt.err (!%p869_p13)
}
 0x35a   : > { %s873_s26 = scalar_lea.hbm %s1216_s29, 128  ;;  %s877_s18 = scalar_lea.hbm %s1266_s3, 256 }
 0x35b   : > { %p874_p9 = scmp.ne.s32.totalorder %s1216_s29, %s873_s26  ;;  %p878_p11 = scmp.lt.u32.totalorder %s1216_s29, %s1266_s3 }
 0x35c   : > { %p879_p1 = scmp.lt.u32.totalorder %s877_s18, %s873_s26  ;;  %p881_p10 = scmp.lt.u32.totalorder %s873_s26, %s1216_s29 }
 0x35d   : > { %p875_p2 = pnand %p874_p9, %p1113_p0 }
 0x35e   : > { %p880_p7 = por %p879_p1, %p878_p11 }
 0x35f   : > { %p876_p6 = pneg %p875_p2 }
 0x360   : > { %p882_p12 = por %p881_p10, %p880_p7 }
 0x362   : > { %p883_p3 = pnand %p882_p12, %p876_p6 }
 0x364   : > { %886 = shalt.err (!%p883_p3)
}
 0x365   : > { %661 = dma.vmem_to_hbm [thread:$0]  (%p1113_p0), %s1210_s9, 128, %s1216_s29, %s451_s5  }
 0x366 PF: > { %s496_s7 = sand.u32 1, %s929_s15   ;;  %p1281_p5 = scmp.ne.s32.totalorder %s1273_s25, 0 }
 0x367   : > { %p1282_p4 = scmp.ge.s32.totalorder %s949_s20, 2  ;;  %s497_s8 = scalar_lea.sflag [#allocation4], %s496_s7 }
 0x369   : > { %p677_p8 = pnand %p1282_p4, %p1281_p5 }
 0x36b   : > { %920 = dma.done.wait (!%p677_p8), %s497_s8, 128  }
 0x36c   : > { %922 = vsyncadd (!%p677_p8), %s497_s8, 4294967168  ;;  %s506_s12 = scalar_lea.sflag [#allocation10], %s496_s7 }
 0x36d   : > { %924 = dma.done.wait (!%p677_p8), %s506_s12, 128  }
 0x36e   : > { %926 = vsyncadd (!%p677_p8), %s506_s12, 4294967168  ;;  %s25_s20 = sadd.s32 1, %s949_s20   ;;  %s1283_s15 = smov %s933_s16 }
 0x36f   : > { %p22_p13 = scmp.ge.s32.totalorder %s25_s20, 4   ;;  %s1284_s16 = smov %s937_s17 }
 0x370   : > { %s1285_s17 = smov %s1122_s28  ;;  %s1286_s18 = smov %s945_s19 }
 0x371   : > { %s1287_s19 = smov %s1289_s6  ;;  %24 = sbr.rel (!%p22_p13) target bundleno = 9 (0x9), region = 104 }
 0x378   :  { %511 = vsyncpa [#allocation3], 1 }
 0x379   :  { %513 = vsyncpa [#allocation3 + $0x1], 1 }
 0x37a   :  { %514 = vsyncpa [#allocation6], 1 }
 0x37b   :  { %515 = vsyncpa [#allocation4], 1 }
 0x37c   :  { %517 = vsyncpa [#allocation4 + $0x1], 1 }
 0x37d   :  { %518 = vsyncpa [#allocation10], 1 }
 0x37e   :  { %520 = vsyncpa [#allocation10 + $0x1], 1 }

// kernel: tpu_custom_call.1
= control target key start
LH: loop header
LB: loop body
LE: loop exit
PB: predicated region body
PF: predicated region fallthrough
CT: control target
= control target key end

     0   :  { %s1332_s0 = inlined_call_operand.hbm [shape: f32[2,8,32], index: 0, kind: input, shape index: {}]   ;;  %s1333_s1 = inlined_call_operand.hbm [shape: f32[2,8,32], index: 1, kind: input, shape index: {}]   ;;  %s1334_s2 = inlined_call_operand.hbm [shape: f32[2,8,128], index: 2, kind: input, shape index: {}]   ;;  %s1335_s3 = inlined_call_operand.hbm [shape: f32[2,8,128], index: 3, kind: output, shape index: {0}]   ;;  %s1336_s4 = inlined_call_operand.hbm [shape: f32[2,8,8], index: 4, kind: output, shape index: {1}]  }
   0x1   :  { %1345 = sst [smem:[#allocation19_spill]] %s1333_s1 }
   0x2   :  { %10 = vsyncpa [#allocation3], 0 }
   0x3   :  { %12 = vsyncpa [#allocation3 + $0x1], 0 }
   0x4   :  { %13 = vsyncpa [#allocation6], 0 }
   0x5   :  { %15 = vsyncpa [#allocation6 + $0x1], 0 }
   0x6   :  { %16 = vsyncpa [#allocation4], 0 }
   0x7   :  { %18 = vsyncpa [#allocation4 + $0x1], 0 }
   0x8   :  { %19 = vsyncpa [#allocation10], 0 }
   0x9   :  { %21 = vsyncpa [#allocation10 + $0x1], 0  ;;  %s1036_s15 = smov 0   ;;  %s1038_s16 = smov 0  }
   0xa   :  { %s1040_s17 = smov 0   ;;  %s1042_s18 = smov 0  }
   0xb   :  { %s1044_s19 = smov 0   ;;  %s1046_s20 = smov 0  }
   0xc LB: > { %1346 = sst [smem:[#allocation15_spill]] %s998_s19  ;;  %s1067_s21 = sadd.s32 4294967295, %s1002_s20   ;;  %s1002_s20 = sphi %s1046_s20, %s27_s20   ;;  %s998_s19 = sphi %s1044_s19, %s1370_s19   ;;  %s994_s18 = sphi %s1042_s18, %s1369_s18   ;;  %s990_s17 = sphi %s1040_s17, %s1373_s17   ;;  %s986_s16 = sphi %s1038_s16, %s1372_s16   ;;  %s982_s15 = sphi %s1036_s15, %s1371_s15  }
   0xd   : > { %1347 = sst [smem:[#allocation16_spill]] %s1002_s20  ;;  %s673_s22 = sadd.s32 4294967294, %s1002_s20  }
   0xe   : > { %s39_s23 = sadd.s32 1, %s998_s19  ;;  %s48_s24 = sadd.s32 1, %s990_s17 }
   0xf   : > { %p41_p0 = scmp.ge.s32.totalorder %s39_s23, 2  ;;  %p55_p1 = scmp.ne.s32.totalorder %s990_s17, %s986_s16 }
  0x10   : > { %p56_p2 = scmp.eq.s32.totalorder %s1002_s20, 0  ;;  %p61_p3 = scmp.ne.s32.totalorder %s986_s16, %s982_s15 }
  0x11   : > { %s1375_s23 = smov (%p41_p0, %s39_s23), 0  ;;  %p62_p5 = scmp.eq.s32.totalorder %s1067_s21, 0 }
  0x12   : > { %1348 = sst [smem:[#allocation17_spill]] %s1375_s23  ;;  %p1079_p4 = por %p56_p2, %p55_p1 }
  0x13   : > { %s43_s26 = ssub.s32 %s998_s19, %s1375_s23  ;;  %p139_p6 = scmp.eq.s32.totalorder %s1067_s21, 1 }
  0x14   : > { %p46_p7 = scmp.eq.s32.totalorder %s43_s26, 0  ;;  %p1087_p8 = por %p62_p5, %p61_p3 }
  0x15   : > { %p1091_p9 = por %p139_p6, %p55_p1  ;;  %p145_p10 = scmp.eq.s32.totalorder %s673_s22, 1 }
  0x16   : > { %s1350_s27 = scalar_select %p1087_p8, 1, 0 }
  0x17   : > { %s1351_s28 = scalar_select %p1091_p9, 1, 0 }
  0x18   : > { %s1096_s29 = scalar_select %p46_p7, %s990_s17, %s48_s24  }
  0x19   : > { %p1098_p11 = por %p145_p10, %p61_p3  ;;  %p738_p13 = scmp.lt.s32.totalorder %s1002_s20, 2 }
  0x1a   : > { %1352 = sst [smem:[#allocation18_spill]] %s1096_s29  ;;  %s1337_s5 = sand.u32 1, %s990_s17  }
  0x1b   : > { %s1353_s30 = scalar_select %p1098_p11, 1, 0 }
  0x1c   : > { %s1107_s6 = sshll.u32 %s1337_s5, 3  ;;  %s1110_s7 = sshll.u32 %s998_s19, 7 }
  0x1d   : > { %p1114_p0 = pnand %p738_p13, %p1079_p4  ;;  %s212_s9 = sand.u32 1, %s1002_s20  }
  0x1e   : > { %s1355_s1 = sld [smem:[#allocation19_spill]]  ;;  %s216_s13 = scalar_lea.vmem [#allocation5], %s1107_s6 }
  0x1f   : > { %s1354_s8 = scalar_select %p1114_p0, 1, 0 }
  0x20   : > { %s223_s14 = sshll.u32 %s216_s13, 4  ;;  %s1130_s22 = scalar_lea.sflag [#allocation6], %s212_s9  ;;  %s1127_s14 = int_to_ptr.vmem [resolvable:$true] %s223_s14 }
  0x21   : > { %p1136_p4 = pneg %p1114_p0 }
  0x24   : > { %s1123_s12 = scalar_lea.hbm %s1355_s1, %s1110_s7  ;;  %s799_s11 = scalar_lea.hbm %s1355_s1, 256 }
  0x25   : > { %s794_s24 = scalar_lea.hbm %s1123_s12, 128  ;;  %p800_p7 = scmp.lt.u32.totalorder %s1123_s12, %s1355_s1 }
  0x26   : > { %p795_p3 = scmp.ne.s32.totalorder %s1123_s12, %s794_s24  ;;  %p801_p10 = scmp.lt.u32.totalorder %s799_s11, %s794_s24 }
  0x27   : > { %p803_p12 = scmp.lt.u32.totalorder %s794_s24, %s1123_s12 }
  0x28   : > { %p797_p5 = pnand %p1136_p4, %p795_p3  ;;  %p802_p13 = por %p801_p10, %p800_p7 }
  0x2a   : > { %p798_p6 = pneg %p797_p5  ;;  %p804_p1 = por %p803_p12, %p802_p13 }
  0x2c   : > { %p805_p2 = pnand %p804_p1, %p798_p6 }
  0x2e   : > { %808 = shalt.err (!%p805_p2)
}
  0x2f   : > { %s809_s9 = scalar_lea.vmem %s1127_s14, 128  ;;  %s1004_s26 = smov [#allocation5]  }
  0x30   : > { %p810_p3 = scmp.ne.s32.totalorder %s1127_s14, %s809_s9  ;;  %s814_s10 = sshll.u32 %s1004_s26, 4  ;;  %s815_s10 = int_to_ptr.vmem [resolvable:$false] %s814_s10 }
  0x31   : > { %s816_s5 = scalar_lea.vmem %s815_s10, 256  ;;  %p817_p9 = scmp.lt.s32.totalorder %s1127_s14, %s815_s10 }
  0x32   : > { %p812_p5 = pnand %p810_p3, %p1136_p4  ;;  %p818_p8 = scmp.lt.s32.totalorder %s816_s5, %s809_s9 }
  0x34   : > { %p813_p11 = pneg %p812_p5  ;;  %p819_p7 = por %p818_p8, %p817_p9 }
  0x36   : > { %p820_p10 = pnand %p819_p7, %p813_p11 }
  0x38   : > { %823 = shalt.err (!%p820_p10)
}
  0x39   : > { %727 = dma.hbm_to_vmem [thread:$0]  (!%p1114_p0), %s1123_s12, 128, %s1127_s14, %s1130_s22  }
  0x3a   : > { %p1357_p12 = scmp.lt.s32.totalorder %s1002_s20, 3  ;;  %p1358_p1 = scmp.ge.s32.totalorder %s1002_s20, 1 }
  0x3b   : > { %s1172_s9 = scalar_lea.hbm %s1332_s0, %s1110_s7  ;;  %s197_s26 = scalar_lea.vmem [#allocation2], %s1107_s6 }
  0x3c   : > { %p1164_p2 = pnand %p1358_p1, %p1357_p12  ;;  %s205_s10 = sshll.u32 %s197_s26, 4  ;;  %s1175_s10 = int_to_ptr.vmem [resolvable:$true] %s205_s10 }
  0x3d   : > { %s1181_s5 = scalar_lea.hbm %s1334_s2, %s1110_s7  ;;  %s1360_s1 = sand.u32 1, %s990_s17  }
  0x3e   : > { %s1359_s24 = scalar_select %p1164_p2, 1, 0 }
  0x3f   : > { %s194_s23 = scalar_lea.sflag [#allocation3], %s1360_s1  ;;  %s824_s19 = scalar_lea.hbm %s1172_s9, 128 }
  0x40   : > { %p825_p8 = scmp.ne.s32.totalorder %s1172_s9, %s824_s19  ;;  %s829_s29 = scalar_lea.hbm %s1332_s0, 256 }
  0x41   : > { %p830_p6 = scmp.lt.u32.totalorder %s1172_s9, %s1332_s0  ;;  %p831_p13 = scmp.lt.u32.totalorder %s829_s29, %s824_s19 }
  0x42   : > { %p827_p9 = pnand %p825_p8, %p1136_p4  ;;  %p833_p5 = scmp.lt.u32.totalorder %s824_s19, %s1172_s9 }
  0x43   : > { %p832_p3 = por %p831_p13, %p830_p6 }
  0x44   : > { %p828_p11 = pneg %p827_p9 }
  0x45   : > { %p834_p7 = por %p833_p5, %p832_p3 }
  0x47   : > { %p835_p10 = pnand %p834_p7, %p828_p11 }
  0x49   : > { %838 = shalt.err (!%p835_p10)
}
  0x4a   : > { %s839_s1 = scalar_lea.vmem %s1175_s10, 128  ;;  %s1005_s7 = smov [#allocation2]  }
  0x4b   : > { %p840_p12 = scmp.ne.s32.totalorder %s1175_s10, %s839_s1  ;;  %s844_s12 = sshll.u32 %s1005_s7, 4  ;;  %s845_s12 = int_to_ptr.vmem [resolvable:$false] %s844_s12 }
  0x4c   : > { %s846_s20 = scalar_lea.vmem %s845_s12, 256  ;;  %p847_p9 = scmp.lt.s32.totalorder %s1175_s10, %s845_s12 }
  0x4d   : > { %p842_p1 = pnand %p840_p12, %p1136_p4  ;;  %p848_p2 = scmp.lt.s32.totalorder %s846_s20, %s839_s1 }
  0x4f   : > { %p843_p8 = pneg %p842_p1  ;;  %p849_p6 = por %p848_p2, %p847_p9 }
  0x51   : > { %p850_p13 = pnand %p849_p6, %p843_p8 }
  0x53   : > { %853 = shalt.err (!%p850_p13)
}
  0x54   : > { %724 = dma.hbm_to_vmem [thread:$0]  (!%p1114_p0), %s1172_s9, 128, %s1175_s10, %s194_s23  }
  0x55   : > { %s234_s19 = scalar_lea.vmem [#allocation7], %s1107_s6  ;;  %s854_s14 = scalar_lea.hbm %s1181_s5, 128 }
  0x56   : > { %s241_s29 = sshll.u32 %s234_s19, 4  ;;  %p855_p11 = scmp.ne.s32.totalorder %s1181_s5, %s854_s14  ;;  %s242_s29 = int_to_ptr.vmem [resolvable:$true] %s241_s29 }
  0x57   : > { %s859_s26 = scalar_lea.hbm %s1334_s2, 256  ;;  %p860_p5 = scmp.lt.u32.totalorder %s1181_s5, %s1334_s2 }
  0x58   : > { %p857_p2 = pnand %p855_p11, %p1136_p4  ;;  %p861_p7 = scmp.lt.u32.totalorder %s859_s26, %s854_s14 }
  0x59   : > { %p863_p12 = scmp.lt.u32.totalorder %s854_s14, %s1181_s5 }
  0x5a   : > { %p858_p3 = pneg %p857_p2  ;;  %p862_p10 = por %p861_p7, %p860_p5 }
  0x5c   : > { %p864_p1 = por %p863_p12, %p862_p10 }
  0x5e   : > { %p865_p8 = pnand %p864_p1, %p858_p3 }
  0x60   : > { %868 = shalt.err (!%p865_p8)
}
  0x61   : > { %s869_s23 = scalar_lea.vmem %s242_s29, 128  ;;  %s1006_s6 = smov [#allocation7]  }
  0x62   : > { %p870_p9 = scmp.ne.s32.totalorder %s242_s29, %s869_s23  ;;  %s874_s9 = sshll.u32 %s1006_s6, 4  ;;  %s875_s9 = int_to_ptr.vmem [resolvable:$false] %s874_s9 }
  0x63   : > { %s876_s10 = scalar_lea.vmem %s875_s9, 256  ;;  %p877_p11 = scmp.lt.s32.totalorder %s242_s29, %s875_s9 }
  0x64   : > { %p872_p6 = pnand %p870_p9, %p1136_p4  ;;  %p878_p2 = scmp.lt.s32.totalorder %s876_s10, %s869_s23 }
  0x66   : > { %p873_p13 = pneg %p872_p6  ;;  %p879_p0 = por %p878_p2, %p877_p11 }
  0x68   : > { %p880_p5 = pnand %p879_p0, %p873_p13 }
  0x6a   : > { %883 = shalt.err (!%p880_p5)
}
  0x6b   : > { %p1361_p7 = scmp.ne.s32.totalorder %s1354_s8, 0  ;;  %p1362_p3 = scmp.ne.s32.totalorder %s1359_s24, 0 }
  0x6c   : > { %s1228_s25 = sand.u32 (!%p1362_p3), 1, %s986_s16   ;;  %p1363_p0 = scmp.ne.s32.totalorder (!%p1362_p3), %s1350_s27, 0 }
  0x6d   : > { %730 = dma.hbm_to_vmem [thread:$0]  (!%p1361_p7), %s1181_s5, 128, %s242_s29, %s1130_s22  }
  0x6e   : > { %250 = sbr.rel (%p1362_p3) target bundleno = 879 (0x36f), region = 32  ;;  %s1231_s12 = sshll.u32 (!%p1362_p3), %s1228_s25, 3 }
  0x6f   : > { %s253_s20 = scalar_lea.sflag (!%p1362_p3), [#allocation3], %s1228_s25  ;;  %s256_s19 = scalar_lea.vmem (!%p1362_p3), [#allocation2], %s1231_s12 }
  0x75   : > { %965 = dma.done.wait (%p1363_p0), %s253_s20, 128  }
  0x76   : > { %967 = vsyncadd (%p1363_p0), %s253_s20, 4294967168  ;;  %s261_s8 = sand.u32 1, %s1067_s21   ;;  %s265_s24 = scalar_lea.vmem [#allocation5], %s1231_s12 }
  0x77   : > { %s262_s22 = scalar_lea.sflag [#allocation6], %s261_s8 }
  0x78   : > { %969 = dma.done.wait (%p1363_p0), %s262_s22, 256  }
  0x79   : > { %971 = vsyncadd (%p1363_p0), %s262_s22, 4294967040  ;;  %v1007_v0 = vmov 0.0   ;;  %vm1008_vm0 = vmmov 0   ;;  %vm318_vm1 = vcmask 261120   ;;  %v315_v1 = vld [vmem:[%s265_s24] sm:$0xff]  ;;  %v314_v2 = vld [vmem:[%s256_s19] sm:$0xff] }
  0x7a   : > { %701 = vmatprep.subr.mxu0 %v1007_v0  ;;  %703 = vmatprep.mubr.msk.f32.mxu0 %vm1008_vm0, %v1007_v0  ;;  %v317_v3 = vmul.f32 0.17677669, %v314_v2  ;;  %vm395_vm2 = vcmask 64512   ;;  %s274_s21 = scalar_lea.vmem [#allocation7], %s1231_s12  ;;  %s313_s27 = scalar_lea.vmem [#allocation9], %s1231_s12 }
  0x7b   : > { %706 = vmatprep.subr.mxu1 %v1007_v0  ;;  %708 = vmatprep.mubr.msk.f32.mxu1 %vm1008_vm0, %v1007_v0  ;;  %v316_v12 = vld [vmem:[%s274_s21] sm:$0xff]  ;;  %s693_s5 = sshll.u32 %s994_s18, 7  ;;  %s516_s13 = sshll.u32 %s313_s27, 4  ;;  %s517_s13 = int_to_ptr.vmem [resolvable:$true] %s516_s13 }
  0x7c   : > { %702 = vmatpush3.xpose.msk.msra.mxu0 %vm318_vm1, %v315_v1  ;;  %707 = vmatpush3.msra.mxu1 %v316_v12  ;;  %s1257_s11 = scalar_lea.hbm %s1336_s4, %s693_s5  ;;  %s488_s26 = scalar_lea.sflag [#allocation10], %s1228_s25 }
  0x7d   : > { %s884_s1 = scalar_lea.vmem %s517_s13, 128  ;;  %p1364_p10 = scmp.ne.s32.totalorder %s1351_s28, 0 }
  0x7e   : > { %p885_p4 = scmp.ne.s32.totalorder %s517_s13, %s884_s1  ;;  %s1009_s7 = smov [#allocation9]  }
  0x7f   : > { %704 = vmatmul.mubr.msk.f32.vlgmr.msra.gmra.mrb[0].mxu0 %vm318_vm1, %v317_v3  ;;  %s888_s23 = sshll.u32 %s1009_s7, 4  ;;  %s889_s23 = int_to_ptr.vmem [resolvable:$false] %s888_s23 }
  0x80   : > { %p886_p12 = pnand %p885_p4, %p1364_p10  ;;  %s890_s6 = scalar_lea.vmem %s889_s23, 256 }
  0x81   : > { %p891_p8 = scmp.lt.s32.totalorder %s517_s13, %s889_s23  ;;  %p892_p9 = scmp.lt.s32.totalorder %s890_s6, %s884_s1 }
  0x82   : > { %p887_p1 = pneg %p886_p12 }
  0x83   : > { %p893_p6 = por %p892_p9, %p891_p8 }
  0x85   : > { %p894_p13 = pnand %p893_p6, %p887_p1 }
 0x152   : > { %v391_v4 = vpop.f32.mrb[0].mxu0 }
 0x153   : > { %v705_v5 = vpop.f32.mrb[1].mxu0  ;;  %v396_v6 = vsel %vm395_vm2, %v391_v4, -inf }
 0x154   : > { %397 = vmax.xlane.f32.xlu0 %v396_v6 }
 0x1e1   : > { %v398_v7 = vpop.xlane.xlu0 %397 }
 0x1e2   : > { %v399_v8 = vsub.f32 %v391_v4, %v398_v7 }
 0x1e4   : > { %v400_v9 = vmul.f32 1.442695, %v399_v8 }
 0x1e6   : > { %790 = vpow2.f32 %v400_v9 }
 0x1f0   : > { %v791_v10 = vpop.eup %790 }
 0x1f1   : > { %v402_v11 = vsel %vm395_vm2, %v791_v10, 0.0 }
 0x1f2   : > { %403 = vadd.xlane.f32.xlu0 %v402_v11 }
 0x27f   : > { %v404_v13 = vpop.xlane.xlu0 %403 }
 0x280   : > { %792 = vrcp.f32 %v404_v13 }
 0x28a   : > { %v793_v14 = vpop.eup %792 }
 0x28b   : > { %v406_v15 = vmul.f32 %v793_v14, %v791_v10 }
 0x28d   : > { %709 = vmatmul.mubr.msk.f32.vlgmr.msra.gmra.mrb[0].mxu1 %vm395_vm2, %v406_v15  ;;  %480 = vst.msk [vmem:[%s313_s27] sm:$0xff] %vm395_vm2, %v406_v15 }
 0x28e   : > { %897 = shalt.err (!%p894_p13)
}
 0x28f   : > { %s898_s9 = scalar_lea.hbm %s1257_s11, 128  ;;  %s902_s19 = scalar_lea.hbm %s1336_s4, 256 }
 0x290   : > { %p899_p11 = scmp.ne.s32.totalorder %s1257_s11, %s898_s9  ;;  %p903_p7 = scmp.lt.u32.totalorder %s1257_s11, %s1336_s4 }
 0x291   : > { %p904_p3 = scmp.lt.u32.totalorder %s902_s19, %s898_s9  ;;  %p906_p4 = scmp.lt.u32.totalorder %s898_s9, %s1257_s11 }
 0x292   : > { %p900_p2 = pnand %p899_p11, %p1364_p10 }
 0x293   : > { %p905_p0 = por %p904_p3, %p903_p7 }
 0x294   : > { %p901_p5 = pneg %p900_p2 }
 0x295   : > { %p907_p12 = por %p906_p4, %p905_p0 }
 0x297   : > { %p908_p1 = pnand %p907_p12, %p901_p5 }
 0x299   : > { %911 = shalt.err (!%p908_p1)
}
 0x29a   : > { %718 = dma.vmem_to_hbm [thread:$0]  (%p1364_p10), %s517_s13, 128, %s1257_s11, %s488_s26  }
 0x29b   : > { %s306_s24 = scalar_lea.vmem [#allocation8], %s1231_s12  ;;  %s1285_s14 = scalar_lea.hbm %s1335_s3, %s693_s5 }
 0x29c   : > { %s502_s21 = sshll.u32 %s306_s24, 4  ;;  %s483_s1 = scalar_lea.sflag [#allocation4], %s1228_s25  ;;  %s1278_s21 = int_to_ptr.vmem [resolvable:$true] %s502_s21 }
 0x29d   : > { %s912_s7 = scalar_lea.vmem %s1278_s21, 128  ;;  %s1010_s12 = smov [#allocation8]  }
 0x29e   : > { %p913_p8 = scmp.ne.s32.totalorder %s1278_s21, %s912_s7  ;;  %s916_s11 = sshll.u32 %s1010_s12, 4  ;;  %s917_s11 = int_to_ptr.vmem [resolvable:$false] %s916_s11 }
 0x29f   : > { %s918_s18 = scalar_lea.vmem %s917_s11, 256  ;;  %p919_p13 = scmp.lt.s32.totalorder %s1278_s21, %s917_s11 }
 0x2a0   : > { %p914_p9 = pnand %p913_p8, %p1364_p10  ;;  %p920_p11 = scmp.lt.s32.totalorder %s918_s18, %s912_s7 }
 0x2a2   : > { %p915_p6 = pneg %p914_p9  ;;  %p921_p2 = por %p920_p11, %p919_p13 }
 0x2a4   : > { %p922_p5 = pnand %p921_p2, %p915_p6 }
 0x360   : > { %v476_v16 = vpop.f32.mrb[0].mxu1 }
 0x361   : > { %481 = vst [vmem:[%s306_s24] sm:$0xff] %v476_v16  ;;  %v710_v17 = vpop.f32.mrb[1].mxu1 }
 0x362   : > { %925 = shalt.err (!%p922_p5)
}
 0x363   : > { %s926_s25 = scalar_lea.hbm %s1285_s14, 128  ;;  %s930_s26 = scalar_lea.hbm %s1335_s3, 256 }
 0x364   : > { %p927_p7 = scmp.ne.s32.totalorder %s1285_s14, %s926_s25  ;;  %p931_p4 = scmp.lt.u32.totalorder %s1285_s14, %s1335_s3 }
 0x365   : > { %p932_p12 = scmp.lt.u32.totalorder %s930_s26, %s926_s25  ;;  %p934_p8 = scmp.lt.u32.totalorder %s926_s25, %s1285_s14 }
 0x366   : > { %p928_p3 = pnand %p927_p7, %p1364_p10 }
 0x367   : > { %p933_p1 = por %p932_p12, %p931_p4 }
 0x368   : > { %p929_p0 = pneg %p928_p3 }
 0x369   : > { %p935_p9 = por %p934_p8, %p933_p1 }
 0x36b   : > { %p936_p6 = pnand %p935_p9, %p929_p0 }
 0x36d   : > { %939 = shalt.err (!%p936_p6)
}
 0x36e   : > { %717 = dma.vmem_to_hbm [thread:$0]  (%p1364_p10), %s1278_s21, 128, %s1285_s14, %s483_s1  }
 0x36f PF: > { %s1365_s9 = sld [smem:[#allocation16_spill]]  ;;  %s528_s10 = sand.u32 1, %s982_s15  }
 0x370   : > { %p1366_p13 = scmp.ne.s32.totalorder %s1353_s30, 0  ;;  %s529_s20 = scalar_lea.sflag [#allocation4], %s528_s10 }
 0x375   : > { %p1367_p11 = scmp.ge.s32.totalorder %s1365_s9, 2 }
 0x377   : > { %p732_p2 = pnand %p1367_p11, %p1366_p13 }
 0x379   : > { %973 = dma.done.wait (!%p732_p2), %s529_s20, 128  }
 0x37a   : > { %975 = vsyncadd (!%p732_p2), %s529_s20, 4294967168  ;;  %s538_s19 = scalar_lea.sflag [#allocation10], %s528_s10 }
 0x37b   : > { %977 = dma.done.wait (!%p732_p2), %s538_s19, 128  }
 0x37c   : > { %979 = vsyncadd (!%p732_p2), %s538_s19, 4294967168  ;;  %s27_s20 = sadd.s32 1, %s1365_s9   ;;  %s1368_s28 = sld [smem:[#allocation18_spill]] }
 0x37d   : > { %p24_p5 = scmp.ge.s32.totalorder %s27_s20, 4   ;;  %s1369_s18 = sld [smem:[#allocation15_spill]] }
 0x37e   : > { %s1370_s19 = sld [smem:[#allocation17_spill]]  ;;  %s1371_s15 = smov %s986_s16 }
 0x37f   : > { %s1372_s16 = smov %s990_s17  ;;  %26 = sbr.rel (!%p24_p5) target bundleno = 12 (0xc), region = 118 }
 0x382   : > { %s1373_s17 = smov %s1368_s28 }
 0x386   :  { %543 = vsyncpa [#allocation3], 1 }
 0x387   :  { %545 = vsyncpa [#allocation3 + $0x1], 1 }
 0x388   :  { %546 = vsyncpa [#allocation6], 1 }
 0x389   :  { %548 = vsyncpa [#allocation6 + $0x1], 1 }
 0x38a   :  { %549 = vsyncpa [#allocation4], 1 }
 0x38b   :  { %551 = vsyncpa [#allocation4 + $0x1], 1 }
 0x38c   :  { %552 = vsyncpa [#allocation10], 1 }
 0x38d   :  { %554 = vsyncpa [#allocation10 + $0x1], 1 }

</bundles_post_ra>
